<compile_context>
chip_gen: v5e
topology: v5e:2x2
jax: 0.10.0
libtpu: 0.0.40
codegen_flags: <defaults>
</compile_context>

<pallas_src>
import math
import functools

import jax
import jax.numpy as jnp
import numpy as np
from jax.experimental import pallas as pl
from jax.experimental.pallas import tpu as pltpu


def _layer_norm(v, gamma, beta, eps=1e-5):
    # v: (rows, D) fp32; gamma/beta: (1, D) fp32
    mean = jnp.mean(v, axis=-1, keepdims=True)
    var = jnp.mean((v - mean) ** 2, axis=-1, keepdims=True)
    return (v - mean) * jax.lax.rsqrt(var + eps) * gamma + beta


def transformer_layer_kernel(
    x_ref,       # (BB, S, D)  fp32
    ln_ref,      # (4, D)      fp32: [g1, b1, g2, b2]
    wqkv_ref,    # (D, 3D)     bf16: [Q heads | K heads | V heads], Q pre-scaled by 1/sqrt(d)
    bqkv_ref,    # (1, 3D)     fp32  (Q part pre-scaled)
    wp_ref,      # (D, D)      bf16
    w1_ref,      # (D, D)      bf16
    w2_ref,      # (D, D)      bf16
    bmlp_ref,    # (3, D)      fp32: [bp, bm1, bm2]
    o_ref,       # (BB, S, D)  fp32
    ctx_ref,     # (BB, S, D)  bf16 scratch: concatenated per-head attention outputs
    *,
    num_heads,
):
    BB, S, D = x_ref.shape
    H = num_heads
    d = D // H

    # Flatten the batch block into the matmul M dimension for all row-wise ops.
    x = x_ref[...].reshape(BB * S, D)                        # fp32

    g1 = ln_ref[0][None, :]
    b1 = ln_ref[1][None, :]
    g2 = ln_ref[2][None, :]
    b2 = ln_ref[3][None, :]
    bp = bmlp_ref[0][None, :]
    bm1 = bmlp_ref[1][None, :]
    bm2 = bmlp_ref[2][None, :]

    # ---- LayerNorm 1 (fp32) ----
    x1 = _layer_norm(x, g1, b1)

    # ---- Fused Q/K/V projection (one lane-dense matmul); single bf16 cast ----
    qkv = (jnp.dot(x1.astype(jnp.bfloat16), wqkv_ref[...],
                   preferred_element_type=jnp.float32) + bqkv_ref[...]
           ).astype(jnp.bfloat16)                            # (BB*S, 3D) bf16
    qkv = qkv.reshape(BB, S, 3 * D)                          # per-batch view

    # ---- Per-head attention; write head outputs contiguously into bf16 scratch ----
    for h in range(H):                                       # H is small: static unroll
        q = qkv[:, :, h * d:(h + 1) * d]                     # (BB, S, d) bf16 (pre-scaled)
        k = qkv[:, :, D + h * d:D + (h + 1) * d]
        v = qkv[:, :, 2 * D + h * d:2 * D + (h + 1) * d]

        # scores: contract last dims (no explicit transpose of K); scale already in Q
        att = jnp.einsum("bqd,bkd->bqk", q, k, preferred_element_type=jnp.float32)
        # NOTE: reference applies softmax over dim=1 == the *query* axis.
        att = att - jnp.max(att, axis=1, keepdims=True)
        e = jnp.exp(att)
        p = e * pl.reciprocal(jnp.sum(e, axis=1, keepdims=True), approx=True)

        head_out = jnp.einsum("bqk,bkd->bqd", p.astype(jnp.bfloat16), v,
                              preferred_element_type=jnp.float32)     # (BB, S, d)
        ctx_ref[:, :, h * d:(h + 1) * d] = head_out.astype(jnp.bfloat16)

    # ---- Single full-depth output projection over all heads ----
    proj = jnp.dot(ctx_ref[...].reshape(BB * S, D), wp_ref[...],
                   preferred_element_type=jnp.float32)

    # dropout_x is identity in eval mode
    xres = proj + bp + x                                     # bias + residual (fp32)

    # ---- LayerNorm 2 (fp32) ----
    y = _layer_norm(xres, g2, b2)

    # ---- MLP: Linear -> exact GELU -> Linear (dropout = identity) ----
    h1 = jnp.dot(y.astype(jnp.bfloat16), w1_ref[...],
                 preferred_element_type=jnp.float32) + bm1
    h1 = 0.5 * h1 * (1.0 + jax.lax.erf(h1 * (1.0 / math.sqrt(2.0))))
    out = jnp.dot(h1.astype(jnp.bfloat16), w2_ref[...],
                  preferred_element_type=jnp.float32) + bm2

    o_ref[...] = out.reshape(BB, S, D).astype(o_ref.dtype)


def _vmem_limit_bytes():
    """Generation-aware VMEM budget (leave headroom for compiler scratch)."""
    cap = None
    try:
        info = pltpu.get_tpu_info()
        cap = getattr(info, "vmem_capacity_bytes", None)
    except Exception:
        cap = None
    if cap is None:
        return 40 * 1024 * 1024            # conservative: safe on every generation
    if cap >= 100 * 1024 * 1024:           # v5e / v6e: 128 MiB physical
        return 100 * 1024 * 1024
    return 44 * 1024 * 1024                # v7x: 64 MiB physical


def _pick_batch_block(B, S, D, vmem_limit):
    """Largest batch block that fits a VMEM budget while keeping >=2 (pref >=4-8) grid steps."""
    # Rough per-batch-element footprint of one grid step (bytes):
    per_b = S * D * 4 * 4                  # x + out blocks, fp32, double-buffered
    per_b += S * D * 2                     # bf16 ctx scratch
    per_b += S * D * (4 * 8 + 2 * 4)       # fp32/bf16 activation temporaries
    per_b += S * S * 4 * 2                 # per-head score / probability buffers (fp32)
    weights = 12 * D * D + 64 * D          # bf16 wqkv+wp+w1+w2 (single-buffered) + small fp32 params
    budget = int(vmem_limit * 0.8) - weights
    bb_cap = max(1, budget // per_b)

    divisors = [b for b in range(1, B + 1) if B % b == 0]
    candidates = [b for b in divisors if b <= bb_cap] or [1]
    target_steps = 8 if B >= 16 else (4 if B >= 4 else (2 if B >= 2 else 1))
    good = [b for b in candidates if B // b >= target_steps]
    return max(good) if good else max(candidates)


def transformer_layer(x, params, num_heads, batch_block=None):
    """x: (B, S, D) float32. params: dict of weight arrays (see init_params)."""
    B, S, D = x.shape
    H = num_heads
    assert D % H == 0
    d = D // H
    inv_norm = 1.0 / math.sqrt(d)

    vmem_limit = _vmem_limit_bytes()
    if batch_block is None:
        batch_block = _pick_batch_block(B, S, D, vmem_limit)
    assert B % batch_block == 0
    num_blocks = B // batch_block

    # ---- pre-pack parameters (wrapper-side, once) ----
    def heads_to_cols(w):                                    # (H, D, d) -> (D, H*d)
        return jnp.transpose(w, (1, 0, 2)).reshape(D, H * d)

    # Fold 1/sqrt(d) into the Q projection (weights + bias) so the kernel does not
    # scale the (BB, S, S) score tensor.
    wqkv = jnp.concatenate(
        [heads_to_cols(params["wq"] * inv_norm),
         heads_to_cols(params["wk"]),
         heads_to_cols(params["wv"])], axis=1).astype(jnp.bfloat16)   # (D, 3D)
    bqkv = jnp.concatenate(
        [(params["bq"] * inv_norm).reshape(-1),
         params["bk"].reshape(-1),
         params["bv"].reshape(-1)]).astype(jnp.float32).reshape(1, 3 * D)
    ln = jnp.stack([params["g1"], params["b1"],
                    params["g2"], params["b2"]]).astype(jnp.float32)  # (4, D)
    wp = params["wp"].astype(jnp.bfloat16)
    w1 = params["w1"].astype(jnp.bfloat16)
    w2 = params["w2"].astype(jnp.bfloat16)
    bmlp = jnp.stack([params["bp"], params["bm1"],
                      params["bm2"]]).astype(jnp.float32)             # (3, D)

    param_list = [ln, wqkv, bqkv, wp, w1, w2, bmlp]

    def _const_spec(p):
        nd = p.ndim
        # Constant index_map -> second pipeline buffer never used: single-buffer it.
        return pl.BlockSpec(p.shape, lambda i, nd=nd: (0,) * nd,
                            pipeline_mode=pl.Buffered(1))

    x_spec = pl.BlockSpec((batch_block, S, D), lambda i: (i, 0, 0))
    out_spec = pl.BlockSpec((batch_block, S, D), lambda i: (i, 0, 0))

    kernel = functools.partial(transformer_layer_kernel, num_heads=H)

    return pl.pallas_call(
        kernel,
        out_shape=jax.ShapeDtypeStruct((B, S, D), x.dtype),
        grid_spec=pltpu.PrefetchScalarGridSpec(
            num_scalar_prefetch=0,
            grid=(num_blocks,),
            in_specs=[x_spec] + [_const_spec(p) for p in param_list],
            out_specs=out_spec,
            scratch_shapes=[pltpu.VMEM((batch_block, S, D), jnp.bfloat16)],
        ),
        compiler_params=pltpu.CompilerParams(
            dimension_semantics=("parallel",),
            vmem_limit_bytes=vmem_limit,
        ),
    )(x, *param_list)


def init_params(key, embed_dim, num_heads):
    """Deterministic synthetic weights. Linear weights stored as (in, out)."""
    d = embed_dim // num_heads
    ks = jax.random.split(key, 16)
    n = lambda k, shape, scale=0.02: scale * jax.random.normal(k, shape, jnp.float32)
    return {
        # LayerNorm 1
        "g1": 1.0 + n(ks[0], (embed_dim,), 0.1),
        "b1": n(ks[1], (embed_dim,), 0.1),
        # per-head q/k/v projections, stacked over heads: (H, D, d)
        "wq": n(ks[2], (num_heads, embed_dim, d)),
        "bq": n(ks[3], (num_heads, d)),
        "wk": n(ks[4], (num_heads, embed_dim, d)),
        "bk": n(ks[5], (num_heads, d)),
        "wv": n(ks[6], (num_heads, embed_dim, d)),
        "bv": n(ks[7], (num_heads, d)),
        # output projector
        "wp": n(ks[8], (embed_dim, embed_dim)),
        "bp": n(ks[9], (embed_dim,), 0.1),
        # LayerNorm 2
        "g2": 1.0 + n(ks[10], (embed_dim,), 0.1),
        "b2": n(ks[11], (embed_dim,), 0.1),
        # MLP (both linears are embed_dim -> embed_dim, as in MlpBlock(embed_dim, ...))
        "w1": n(ks[12], (embed_dim, embed_dim)),
        "bm1": n(ks[13], (embed_dim,), 0.1),
        "w2": n(ks[14], (embed_dim, embed_dim)),
        "bm2": n(ks[15], (embed_dim,), 0.1),
    }


def reference_forward(x, p):
    """Pure-JAX fp32 reference matching the PyTorch module (eval mode)."""
    def ln(v, g, b, eps=1e-5):
        m = v.mean(-1, keepdims=True)
        var = ((v - m) ** 2).mean(-1, keepdims=True)
        return (v - m) / jnp.sqrt(var + eps) * g + b

    d = p["wq"].shape[-1]
    x1 = ln(x, p["g1"], p["b1"])
    heads = []
    for h in range(p["wq"].shape[0]):
        q = x1 @ p["wq"][h] + p["bq"][h]
        k = x1 @ p["wk"][h] + p["bk"][h]
        v = x1 @ p["wv"][h] + p["bv"][h]
        att = jnp.einsum("bqd,bkd->bqk", q, k) / (d ** 0.5)
        att = jax.nn.softmax(att, axis=1)          # softmax over *query* axis (dim=1)
        heads.append(jnp.einsum("bqk,bkd->bqd", att, v))
    mh = jnp.concatenate(heads, axis=-1)
    xres = mh @ p["wp"] + p["bp"] + x
    y = ln(xres, p["g2"], p["b2"])
    h1 = y @ p["w1"] + p["bm1"]
    h1 = 0.5 * h1 * (1.0 + jax.lax.erf(h1 / jnp.sqrt(2.0)))
    return h1 @ p["w2"] + p["bm2"]


if __name__ == "__main__":
    # Small shapes consistent with the module: (batch, seq, embed_dim)
    B, S, D, H = 2, 8, 32, 4

    key = jax.random.PRNGKey(0)
    k_x, k_p = jax.random.split(key)
    x = jax.random.normal(k_x, (B, S, D), jnp.float32)
    params = init_params(k_p, D, H)
    # TODO(synk): dropout layers are treated as identity (eval mode); training-mode
    # stochastic dropout is not implemented in the kernel.

    out = transformer_layer(x, params, num_heads=H)
    out = jax.block_until_ready(out)

    ref = reference_forward(x, params)
    np.testing.assert_allclose(np.asarray(out), np.asarray(ref), atol=1e-2, rtol=1e-2)

    print("KERNEL_OK")
</pallas_src>

<mosaic_0001>
module attributes {stable_mosaic.version = 11 : i64} {
  func.func @transformer_layer_kernel(%arg0: i32, %arg1: memref<1x8x32xf32, #tpu.memory_space<vmem>>, %arg2: memref<4x32xf32, #tpu.memory_space<vmem>>, %arg3: memref<32x96xbf16, #tpu.memory_space<vmem>>, %arg4: memref<1x96xf32, #tpu.memory_space<vmem>>, %arg5: memref<32x32xbf16, #tpu.memory_space<vmem>>, %arg6: memref<32x32xbf16, #tpu.memory_space<vmem>>, %arg7: memref<32x32xbf16, #tpu.memory_space<vmem>>, %arg8: memref<3x32xf32, #tpu.memory_space<vmem>>, %arg9: memref<1x8x32xf32, #tpu.memory_space<vmem>>, %arg10: memref<1x8x32xbf16, #tpu.memory_space<vmem>>) attributes {dimension_semantics = [#tpu.dimension_semantics<parallel>], iteration_bounds = array<i64: 2>, scalar_prefetch = 0 : i64, scratch_operands = 1 : i64, tpu.core_type = #tpu.core_type<tc>, window_params = [{transform_indices = @transform_0, window_bounds = array<i64: 1, 8, 32>}, {pipeline_mode = #tpu.pipeline_mode<synchronous>, transform_indices = @transform_1, window_bounds = array<i64: 4, 32>}, {pipeline_mode = #tpu.pipeline_mode<synchronous>, transform_indices = @transform_2, window_bounds = array<i64: 32, 96>}, {pipeline_mode = #tpu.pipeline_mode<synchronous>, transform_indices = @transform_3, window_bounds = array<i64: 1, 96>}, {pipeline_mode = #tpu.pipeline_mode<synchronous>, transform_indices = @transform_4, window_bounds = array<i64: 32, 32>}, {pipeline_mode = #tpu.pipeline_mode<synchronous>, transform_indices = @transform_5, window_bounds = array<i64: 32, 32>}, {pipeline_mode = #tpu.pipeline_mode<synchronous>, transform_indices = @transform_6, window_bounds = array<i64: 32, 32>}, {pipeline_mode = #tpu.pipeline_mode<synchronous>, transform_indices = @transform_7, window_bounds = array<i64: 3, 32>}, {transform_indices = @transform_8, window_bounds = array<i64: 1, 8, 32>}]} {
    %c0 = arith.constant 0 : index
    %c0_0 = arith.constant 0 : index
    %c0_1 = arith.constant 0 : index
    %0 = vector.load %arg1[%c0, %c0_0, %c0_1] : memref<1x8x32xf32, #tpu.memory_space<vmem>>, vector<1x8x32xf32>
    %1 = vector.shape_cast %0 : vector<1x8x32xf32> to vector<8x32xf32>
    %c0_2 = arith.constant 0 : index
    %c0_3 = arith.constant 0 : index
    %2 = vector.load %arg2[%c0_2, %c0_3] : memref<4x32xf32, #tpu.memory_space<vmem>>, vector<1x32xf32>
    %3 = vector.shape_cast %2 : vector<1x32xf32> to vector<32xf32>
    %4 = vector.shape_cast %3 : vector<32xf32> to vector<1x32xf32>
    %c1 = arith.constant 1 : index
    %c0_4 = arith.constant 0 : index
    %5 = vector.load %arg2[%c1, %c0_4] : memref<4x32xf32, #tpu.memory_space<vmem>>, vector<1x32xf32>
    %6 = vector.shape_cast %5 : vector<1x32xf32> to vector<32xf32>
    %7 = vector.shape_cast %6 : vector<32xf32> to vector<1x32xf32>
    %c2 = arith.constant 2 : index
    %c0_5 = arith.constant 0 : index
    %8 = vector.load %arg2[%c2, %c0_5] : memref<4x32xf32, #tpu.memory_space<vmem>>, vector<1x32xf32>
    %9 = vector.shape_cast %8 : vector<1x32xf32> to vector<32xf32>
    %10 = vector.shape_cast %9 : vector<32xf32> to vector<1x32xf32>
    %c3 = arith.constant 3 : index
    %c0_6 = arith.constant 0 : index
    %11 = vector.load %arg2[%c3, %c0_6] : memref<4x32xf32, #tpu.memory_space<vmem>>, vector<1x32xf32>
    %12 = vector.shape_cast %11 : vector<1x32xf32> to vector<32xf32>
    %13 = vector.shape_cast %12 : vector<32xf32> to vector<1x32xf32>
    %c0_7 = arith.constant 0 : index
    %c0_8 = arith.constant 0 : index
    %14 = vector.load %arg8[%c0_7, %c0_8] : memref<3x32xf32, #tpu.memory_space<vmem>>, vector<1x32xf32>
    %15 = vector.shape_cast %14 : vector<1x32xf32> to vector<32xf32>
    %16 = vector.shape_cast %15 : vector<32xf32> to vector<1x32xf32>
    %c1_9 = arith.constant 1 : index
    %c0_10 = arith.constant 0 : index
    %17 = vector.load %arg8[%c1_9, %c0_10] : memref<3x32xf32, #tpu.memory_space<vmem>>, vector<1x32xf32>
    %18 = vector.shape_cast %17 : vector<1x32xf32> to vector<32xf32>
    %19 = vector.shape_cast %18 : vector<32xf32> to vector<1x32xf32>
    %c2_11 = arith.constant 2 : index
    %c0_12 = arith.constant 0 : index
    %20 = vector.load %arg8[%c2_11, %c0_12] : memref<3x32xf32, #tpu.memory_space<vmem>>, vector<1x32xf32>
    %21 = vector.shape_cast %20 : vector<1x32xf32> to vector<32xf32>
    %22 = vector.shape_cast %21 : vector<32xf32> to vector<1x32xf32>
    %cst = arith.constant dense<0.000000e+00> : vector<8xf32>
    %23 = vector.multi_reduction <add>, %1, %cst [1] : vector<8x32xf32> to vector<8xf32>
    %24 = vector.shape_cast %23 : vector<8xf32> to vector<8x1xf32>
    %cst_13 = arith.constant 3.200000e+01 : f32
    %25 = vector.broadcast %cst_13 : f32 to vector<8x1xf32>
    %26 = arith.divf %24, %25 : vector<8x1xf32>
    %27 = vector.broadcast %26 : vector<8x1xf32> to vector<8x32xf32>
    %28 = arith.subf %1, %27 : vector<8x32xf32>
    %29 = arith.mulf %28, %28 : vector<8x32xf32>
    %cst_14 = arith.constant dense<0.000000e+00> : vector<8xf32>
    %30 = vector.multi_reduction <add>, %29, %cst_14 [1] : vector<8x32xf32> to vector<8xf32>
    %31 = vector.shape_cast %30 : vector<8xf32> to vector<8x1xf32>
    %cst_15 = arith.constant 3.200000e+01 : f32
    %32 = vector.broadcast %cst_15 : f32 to vector<8x1xf32>
    %33 = arith.divf %31, %32 : vector<8x1xf32>
    %34 = vector.broadcast %26 : vector<8x1xf32> to vector<8x32xf32>
    %35 = arith.subf %1, %34 : vector<8x32xf32>
    %cst_16 = arith.constant 9.99999974E-6 : f32
    %36 = vector.broadcast %cst_16 : f32 to vector<8x1xf32>
    %37 = arith.addf %33, %36 : vector<8x1xf32>
    %38 = math.rsqrt %37 : vector<8x1xf32>
    %39 = vector.broadcast %38 : vector<8x1xf32> to vector<8x32xf32>
    %40 = arith.mulf %35, %39 : vector<8x32xf32>
    %41 = vector.broadcast %4 : vector<1x32xf32> to vector<8x32xf32>
    %42 = arith.mulf %40, %41 : vector<8x32xf32>
    %43 = vector.broadcast %7 : vector<1x32xf32> to vector<8x32xf32>
    %44 = arith.addf %42, %43 : vector<8x32xf32>
    %45 = arith.truncf %44 : vector<8x32xf32> to vector<8x32xbf16>
    %c0_17 = arith.constant 0 : index
    %c0_18 = arith.constant 0 : index
    %46 = vector.load %arg3[%c0_17, %c0_18] : memref<32x96xbf16, #tpu.memory_space<vmem>>, vector<32x96xbf16>
    %cst_19 = arith.constant dense<0.000000e+00> : vector<8x96xf32>
    %47 = tpu.matmul %45, %46, %cst_19 {dimension_numbers = #tpu.dot_dimension_numbers<[1], [0], [0], [1], [0, 0, 1, 1], [], []>} : vector<8x32xbf16>, vector<32x96xbf16>, vector<8x96xf32> -> vector<8x96xf32>
    %c0_20 = arith.constant 0 : index
    %c0_21 = arith.constant 0 : index
    %48 = vector.load %arg4[%c0_20, %c0_21] : memref<1x96xf32, #tpu.memory_space<vmem>>, vector<1x96xf32>
    %49 = vector.broadcast %48 : vector<1x96xf32> to vector<8x96xf32>
    %50 = arith.addf %47, %49 : vector<8x96xf32>
    %51 = arith.truncf %50 : vector<8x96xf32> to vector<8x96xbf16>
    %52 = vector.shape_cast %51 : vector<8x96xbf16> to vector<1x8x96xbf16>
    %53 = vector.extract_strided_slice %52 {offsets = [0, 0, 0], sizes = [1, 8, 8], strides = [1, 1, 1]} : vector<1x8x96xbf16> to vector<1x8x8xbf16>
    %54 = vector.extract_strided_slice %52 {offsets = [0, 0, 32], sizes = [1, 8, 8], strides = [1, 1, 1]} : vector<1x8x96xbf16> to vector<1x8x8xbf16>
    %55 = vector.extract_strided_slice %52 {offsets = [0, 0, 64], sizes = [1, 8, 8], strides = [1, 1, 1]} : vector<1x8x96xbf16> to vector<1x8x8xbf16>
    "tpu.trace_start"() <{level = 10 : i32, message = "bqd,bkd->bqk"}> : () -> ()
    %cst_22 = arith.constant dense<0.000000e+00> : vector<1x8x8xf32>
    %56 = tpu.matmul %53, %54, %cst_22 {dimension_numbers = #tpu.dot_dimension_numbers<[2], [2], [1], [1], [0, 0, 0, 1, 1, 1], [0], [0]>} : vector<1x8x8xbf16>, vector<1x8x8xbf16>, vector<1x8x8xf32> -> vector<1x8x8xf32>
    "tpu.trace_stop"() : () -> ()
    %cst_23 = arith.constant dense<0xFF800000> : vector<1x8xf32>
    %57 = vector.multi_reduction <maximumf>, %56, %cst_23 [1] : vector<1x8x8xf32> to vector<1x8xf32>
    %58 = vector.shape_cast %57 : vector<1x8xf32> to vector<1x1x8xf32>
    %59 = vector.broadcast %58 : vector<1x1x8xf32> to vector<1x8x8xf32>
    %60 = arith.subf %56, %59 : vector<1x8x8xf32>
    %61 = math.exp %60 : vector<1x8x8xf32>
    %cst_24 = arith.constant dense<0.000000e+00> : vector<1x8xf32>
    %62 = vector.multi_reduction <add>, %61, %cst_24 [1] : vector<1x8x8xf32> to vector<1x8xf32>
    %63 = vector.shape_cast %62 : vector<1x8xf32> to vector<1x1x8xf32>
    %64 = tpu.reciprocal %63 {approx = true} : vector<1x1x8xf32> -> vector<1x1x8xf32>
    %65 = vector.broadcast %64 : vector<1x1x8xf32> to vector<1x8x8xf32>
    %66 = arith.mulf %61, %65 : vector<1x8x8xf32>
    %67 = arith.truncf %66 : vector<1x8x8xf32> to vector<1x8x8xbf16>
    "tpu.trace_start"() <{level = 10 : i32, message = "bqk,bkd->bqd"}> : () -> ()
    %cst_25 = arith.constant dense<0.000000e+00> : vector<1x8x8xf32>
    %68 = tpu.matmul %67, %55, %cst_25 {dimension_numbers = #tpu.dot_dimension_numbers<[2], [1], [1], [2], [0, 0, 0, 1, 1, 2], [0], [0]>} : vector<1x8x8xbf16>, vector<1x8x8xbf16>, vector<1x8x8xf32> -> vector<1x8x8xf32>
    "tpu.trace_stop"() : () -> ()
    %69 = arith.truncf %68 : vector<1x8x8xf32> to vector<1x8x8xbf16>
    %c0_26 = arith.constant 0 : index
    %c0_27 = arith.constant 0 : index
    %c0_28 = arith.constant 0 : index
    %70 = vector.load %arg10[%c0_26, %c0_27, %c0_28] : memref<1x8x32xbf16, #tpu.memory_space<vmem>>, vector<1x8x8xbf16>
    tpu.vector_store %arg10[%c0_26, %c0_27, %c0_28], %69 {strides = array<i32>} : memref<1x8x32xbf16, #tpu.memory_space<vmem>>, vector<1x8x8xbf16>,
    %71 = vector.extract_strided_slice %52 {offsets = [0, 0, 8], sizes = [1, 8, 8], strides = [1, 1, 1]} : vector<1x8x96xbf16> to vector<1x8x8xbf16>
    %72 = vector.extract_strided_slice %52 {offsets = [0, 0, 40], sizes = [1, 8, 8], strides = [1, 1, 1]} : vector<1x8x96xbf16> to vector<1x8x8xbf16>
    %73 = vector.extract_strided_slice %52 {offsets = [0, 0, 72], sizes = [1, 8, 8], strides = [1, 1, 1]} : vector<1x8x96xbf16> to vector<1x8x8xbf16>
    "tpu.trace_start"() <{level = 10 : i32, message = "bqd,bkd->bqk"}> : () -> ()
    %cst_29 = arith.constant dense<0.000000e+00> : vector<1x8x8xf32>
    %74 = tpu.matmul %71, %72, %cst_29 {dimension_numbers = #tpu.dot_dimension_numbers<[2], [2], [1], [1], [0, 0, 0, 1, 1, 1], [0], [0]>} : vector<1x8x8xbf16>, vector<1x8x8xbf16>, vector<1x8x8xf32> -> vector<1x8x8xf32>
    "tpu.trace_stop"() : () -> ()
    %cst_30 = arith.constant dense<0xFF800000> : vector<1x8xf32>
    %75 = vector.multi_reduction <maximumf>, %74, %cst_30 [1] : vector<1x8x8xf32> to vector<1x8xf32>
    %76 = vector.shape_cast %75 : vector<1x8xf32> to vector<1x1x8xf32>
    %77 = vector.broadcast %76 : vector<1x1x8xf32> to vector<1x8x8xf32>
    %78 = arith.subf %74, %77 : vector<1x8x8xf32>
    %79 = math.exp %78 : vector<1x8x8xf32>
    %cst_31 = arith.constant dense<0.000000e+00> : vector<1x8xf32>
    %80 = vector.multi_reduction <add>, %79, %cst_31 [1] : vector<1x8x8xf32> to vector<1x8xf32>
    %81 = vector.shape_cast %80 : vector<1x8xf32> to vector<1x1x8xf32>
    %82 = tpu.reciprocal %81 {approx = true} : vector<1x1x8xf32> -> vector<1x1x8xf32>
    %83 = vector.broadcast %82 : vector<1x1x8xf32> to vector<1x8x8xf32>
    %84 = arith.mulf %79, %83 : vector<1x8x8xf32>
    %85 = arith.truncf %84 : vector<1x8x8xf32> to vector<1x8x8xbf16>
    "tpu.trace_start"() <{level = 10 : i32, message = "bqk,bkd->bqd"}> : () -> ()
    %cst_32 = arith.constant dense<0.000000e+00> : vector<1x8x8xf32>
    %86 = tpu.matmul %85, %73, %cst_32 {dimension_numbers = #tpu.dot_dimension_numbers<[2], [1], [1], [2], [0, 0, 0, 1, 1, 2], [0], [0]>} : vector<1x8x8xbf16>, vector<1x8x8xbf16>, vector<1x8x8xf32> -> vector<1x8x8xf32>
    "tpu.trace_stop"() : () -> ()
    %87 = arith.truncf %86 : vector<1x8x8xf32> to vector<1x8x8xbf16>
    %c0_33 = arith.constant 0 : index
    %c0_34 = arith.constant 0 : index
    %c8 = arith.constant 8 : index
    %88 = vector.load %arg10[%c0_33, %c0_34, %c8] : memref<1x8x32xbf16, #tpu.memory_space<vmem>>, vector<1x8x8xbf16>
    tpu.vector_store %arg10[%c0_33, %c0_34, %c8], %87 {strides = array<i32>} : memref<1x8x32xbf16, #tpu.memory_space<vmem>>, vector<1x8x8xbf16>,
    %89 = vector.extract_strided_slice %52 {offsets = [0, 0, 16], sizes = [1, 8, 8], strides = [1, 1, 1]} : vector<1x8x96xbf16> to vector<1x8x8xbf16>
    %90 = vector.extract_strided_slice %52 {offsets = [0, 0, 48], sizes = [1, 8, 8], strides = [1, 1, 1]} : vector<1x8x96xbf16> to vector<1x8x8xbf16>
    %91 = vector.extract_strided_slice %52 {offsets = [0, 0, 80], sizes = [1, 8, 8], strides = [1, 1, 1]} : vector<1x8x96xbf16> to vector<1x8x8xbf16>
    "tpu.trace_start"() <{level = 10 : i32, message = "bqd,bkd->bqk"}> : () -> ()
    %cst_35 = arith.constant dense<0.000000e+00> : vector<1x8x8xf32>
    %92 = tpu.matmul %89, %90, %cst_35 {dimension_numbers = #tpu.dot_dimension_numbers<[2], [2], [1], [1], [0, 0, 0, 1, 1, 1], [0], [0]>} : vector<1x8x8xbf16>, vector<1x8x8xbf16>, vector<1x8x8xf32> -> vector<1x8x8xf32>
    "tpu.trace_stop"() : () -> ()
    %cst_36 = arith.constant dense<0xFF800000> : vector<1x8xf32>
    %93 = vector.multi_reduction <maximumf>, %92, %cst_36 [1] : vector<1x8x8xf32> to vector<1x8xf32>
    %94 = vector.shape_cast %93 : vector<1x8xf32> to vector<1x1x8xf32>
    %95 = vector.broadcast %94 : vector<1x1x8xf32> to vector<1x8x8xf32>
    %96 = arith.subf %92, %95 : vector<1x8x8xf32>
    %97 = math.exp %96 : vector<1x8x8xf32>
    %cst_37 = arith.constant dense<0.000000e+00> : vector<1x8xf32>
    %98 = vector.multi_reduction <add>, %97, %cst_37 [1] : vector<1x8x8xf32> to vector<1x8xf32>
    %99 = vector.shape_cast %98 : vector<1x8xf32> to vector<1x1x8xf32>
    %100 = tpu.reciprocal %99 {approx = true} : vector<1x1x8xf32> -> vector<1x1x8xf32>
    %101 = vector.broadcast %100 : vector<1x1x8xf32> to vector<1x8x8xf32>
    %102 = arith.mulf %97, %101 : vector<1x8x8xf32>
    %103 = arith.truncf %102 : vector<1x8x8xf32> to vector<1x8x8xbf16>
    "tpu.trace_start"() <{level = 10 : i32, message = "bqk,bkd->bqd"}> : () -> ()
    %cst_38 = arith.constant dense<0.000000e+00> : vector<1x8x8xf32>
    %104 = tpu.matmul %103, %91, %cst_38 {dimension_numbers = #tpu.dot_dimension_numbers<[2], [1], [1], [2], [0, 0, 0, 1, 1, 2], [0], [0]>} : vector<1x8x8xbf16>, vector<1x8x8xbf16>, vector<1x8x8xf32> -> vector<1x8x8xf32>
    "tpu.trace_stop"() : () -> ()
    %105 = arith.truncf %104 : vector<1x8x8xf32> to vector<1x8x8xbf16>
    %c0_39 = arith.constant 0 : index
    %c0_40 = arith.constant 0 : index
    %c16 = arith.constant 16 : index
    %106 = vector.load %arg10[%c0_39, %c0_40, %c16] : memref<1x8x32xbf16, #tpu.memory_space<vmem>>, vector<1x8x8xbf16>
    tpu.vector_store %arg10[%c0_39, %c0_40, %c16], %105 {strides = array<i32>} : memref<1x8x32xbf16, #tpu.memory_space<vmem>>, vector<1x8x8xbf16>,
    %107 = vector.extract_strided_slice %52 {offsets = [0, 0, 24], sizes = [1, 8, 8], strides = [1, 1, 1]} : vector<1x8x96xbf16> to vector<1x8x8xbf16>
    %108 = vector.extract_strided_slice %52 {offsets = [0, 0, 56], sizes = [1, 8, 8], strides = [1, 1, 1]} : vector<1x8x96xbf16> to vector<1x8x8xbf16>
    %109 = vector.extract_strided_slice %52 {offsets = [0, 0, 88], sizes = [1, 8, 8], strides = [1, 1, 1]} : vector<1x8x96xbf16> to vector<1x8x8xbf16>
    "tpu.trace_start"() <{level = 10 : i32, message = "bqd,bkd->bqk"}> : () -> ()
    %cst_41 = arith.constant dense<0.000000e+00> : vector<1x8x8xf32>
    %110 = tpu.matmul %107, %108, %cst_41 {dimension_numbers = #tpu.dot_dimension_numbers<[2], [2], [1], [1], [0, 0, 0, 1, 1, 1], [0], [0]>} : vector<1x8x8xbf16>, vector<1x8x8xbf16>, vector<1x8x8xf32> -> vector<1x8x8xf32>
    "tpu.trace_stop"() : () -> ()
    %cst_42 = arith.constant dense<0xFF800000> : vector<1x8xf32>
    %111 = vector.multi_reduction <maximumf>, %110, %cst_42 [1] : vector<1x8x8xf32> to vector<1x8xf32>
    %112 = vector.shape_cast %111 : vector<1x8xf32> to vector<1x1x8xf32>
    %113 = vector.broadcast %112 : vector<1x1x8xf32> to vector<1x8x8xf32>
    %114 = arith.subf %110, %113 : vector<1x8x8xf32>
    %115 = math.exp %114 : vector<1x8x8xf32>
    %cst_43 = arith.constant dense<0.000000e+00> : vector<1x8xf32>
    %116 = vector.multi_reduction <add>, %115, %cst_43 [1] : vector<1x8x8xf32> to vector<1x8xf32>
    %117 = vector.shape_cast %116 : vector<1x8xf32> to vector<1x1x8xf32>
    %118 = tpu.reciprocal %117 {approx = true} : vector<1x1x8xf32> -> vector<1x1x8xf32>
    %119 = vector.broadcast %118 : vector<1x1x8xf32> to vector<1x8x8xf32>
    %120 = arith.mulf %115, %119 : vector<1x8x8xf32>
    %121 = arith.truncf %120 : vector<1x8x8xf32> to vector<1x8x8xbf16>
    "tpu.trace_start"() <{level = 10 : i32, message = "bqk,bkd->bqd"}> : () -> ()
    %cst_44 = arith.constant dense<0.000000e+00> : vector<1x8x8xf32>
    %122 = tpu.matmul %121, %109, %cst_44 {dimension_numbers = #tpu.dot_dimension_numbers<[2], [1], [1], [2], [0, 0, 0, 1, 1, 2], [0], [0]>} : vector<1x8x8xbf16>, vector<1x8x8xbf16>, vector<1x8x8xf32> -> vector<1x8x8xf32>
    "tpu.trace_stop"() : () -> ()
    %123 = arith.truncf %122 : vector<1x8x8xf32> to vector<1x8x8xbf16>
    %c0_45 = arith.constant 0 : index
    %c0_46 = arith.constant 0 : index
    %c24 = arith.constant 24 : index
    %124 = vector.load %arg10[%c0_45, %c0_46, %c24] : memref<1x8x32xbf16, #tpu.memory_space<vmem>>, vector<1x8x8xbf16>
    tpu.vector_store %arg10[%c0_45, %c0_46, %c24], %123 {strides = array<i32>} : memref<1x8x32xbf16, #tpu.memory_space<vmem>>, vector<1x8x8xbf16>,
    %c0_47 = arith.constant 0 : index
    %c0_48 = arith.constant 0 : index
    %c0_49 = arith.constant 0 : index
    %125 = vector.load %arg10[%c0_47, %c0_48, %c0_49] : memref<1x8x32xbf16, #tpu.memory_space<vmem>>, vector<1x8x32xbf16>
    %126 = vector.shape_cast %125 : vector<1x8x32xbf16> to vector<8x32xbf16>
    %c0_50 = arith.constant 0 : index
    %c0_51 = arith.constant 0 : index
    %127 = vector.load %arg5[%c0_50, %c0_51] : memref<32x32xbf16, #tpu.memory_space<vmem>>, vector<32x32xbf16>
    %cst_52 = arith.constant dense<0.000000e+00> : vector<8x32xf32>
    %128 = tpu.matmul %126, %127, %cst_52 {dimension_numbers = #tpu.dot_dimension_numbers<[1], [0], [0], [1], [0, 0, 1, 1], [], []>} : vector<8x32xbf16>, vector<32x32xbf16>, vector<8x32xf32> -> vector<8x32xf32>
    %129 = vector.broadcast %16 : vector<1x32xf32> to vector<8x32xf32>
    %130 = arith.addf %128, %129 : vector<8x32xf32>
    %131 = arith.addf %130, %1 : vector<8x32xf32>
    %cst_53 = arith.constant dense<0.000000e+00> : vector<8xf32>
    %132 = vector.multi_reduction <add>, %131, %cst_53 [1] : vector<8x32xf32> to vector<8xf32>
    %133 = vector.shape_cast %132 : vector<8xf32> to vector<8x1xf32>
    %cst_54 = arith.constant 3.200000e+01 : f32
    %134 = vector.broadcast %cst_54 : f32 to vector<8x1xf32>
    %135 = arith.divf %133, %134 : vector<8x1xf32>
    %136 = vector.broadcast %135 : vector<8x1xf32> to vector<8x32xf32>
    %137 = arith.subf %131, %136 : vector<8x32xf32>
    %138 = arith.mulf %137, %137 : vector<8x32xf32>
    %cst_55 = arith.constant dense<0.000000e+00> : vector<8xf32>
    %139 = vector.multi_reduction <add>, %138, %cst_55 [1] : vector<8x32xf32> to vector<8xf32>
    %140 = vector.shape_cast %139 : vector<8xf32> to vector<8x1xf32>
    %cst_56 = arith.constant 3.200000e+01 : f32
    %141 = vector.broadcast %cst_56 : f32 to vector<8x1xf32>
    %142 = arith.divf %140, %141 : vector<8x1xf32>
    %143 = vector.broadcast %135 : vector<8x1xf32> to vector<8x32xf32>
    %144 = arith.subf %131, %143 : vector<8x32xf32>
    %cst_57 = arith.constant 9.99999974E-6 : f32
    %145 = vector.broadcast %cst_57 : f32 to vector<8x1xf32>
    %146 = arith.addf %142, %145 : vector<8x1xf32>
    %147 = math.rsqrt %146 : vector<8x1xf32>
    %148 = vector.broadcast %147 : vector<8x1xf32> to vector<8x32xf32>
    %149 = arith.mulf %144, %148 : vector<8x32xf32>
    %150 = vector.broadcast %10 : vector<1x32xf32> to vector<8x32xf32>
    %151 = arith.mulf %149, %150 : vector<8x32xf32>
    %152 = vector.broadcast %13 : vector<1x32xf32> to vector<8x32xf32>
    %153 = arith.addf %151, %152 : vector<8x32xf32>
    %154 = arith.truncf %153 : vector<8x32xf32> to vector<8x32xbf16>
    %c0_58 = arith.constant 0 : index
    %c0_59 = arith.constant 0 : index
    %155 = vector.load %arg6[%c0_58, %c0_59] : memref<32x32xbf16, #tpu.memory_space<vmem>>, vector<32x32xbf16>
    %cst_60 = arith.constant dense<0.000000e+00> : vector<8x32xf32>
    %156 = tpu.matmul %154, %155, %cst_60 {dimension_numbers = #tpu.dot_dimension_numbers<[1], [0], [0], [1], [0, 0, 1, 1], [], []>} : vector<8x32xbf16>, vector<32x32xbf16>, vector<8x32xf32> -> vector<8x32xf32>
    %157 = vector.broadcast %19 : vector<1x32xf32> to vector<8x32xf32>
    %158 = arith.addf %156, %157 : vector<8x32xf32>
    %cst_61 = arith.constant 5.000000e-01 : f32
    %159 = vector.broadcast %cst_61 : f32 to vector<8x32xf32>
    %160 = arith.mulf %159, %158 : vector<8x32xf32>
    %cst_62 = arith.constant 0.707106769 : f32
    %161 = vector.broadcast %cst_62 : f32 to vector<8x32xf32>
    %162 = arith.mulf %158, %161 : vector<8x32xf32>
    %163 = math.erf %162 : vector<8x32xf32>
    %cst_63 = arith.constant 1.000000e+00 : f32
    %164 = vector.broadcast %cst_63 : f32 to vector<8x32xf32>
    %165 = arith.addf %164, %163 : vector<8x32xf32>
    %166 = arith.mulf %160, %165 : vector<8x32xf32>
    %167 = arith.truncf %166 : vector<8x32xf32> to vector<8x32xbf16>
    %c0_64 = arith.constant 0 : index
    %c0_65 = arith.constant 0 : index
    %168 = vector.load %arg7[%c0_64, %c0_65] : memref<32x32xbf16, #tpu.memory_space<vmem>>, vector<32x32xbf16>
    %cst_66 = arith.constant dense<0.000000e+00> : vector<8x32xf32>
    %169 = tpu.matmul %167, %168, %cst_66 {dimension_numbers = #tpu.dot_dimension_numbers<[1], [0], [0], [1], [0, 0, 1, 1], [], []>} : vector<8x32xbf16>, vector<32x32xbf16>, vector<8x32xf32> -> vector<8x32xf32>
    %170 = vector.broadcast %22 : vector<1x32xf32> to vector<8x32xf32>
    %171 = arith.addf %169, %170 : vector<8x32xf32>
    %172 = vector.shape_cast %171 : vector<8x32xf32> to vector<1x8x32xf32>
    %c0_67 = arith.constant 0 : index
    %c0_68 = arith.constant 0 : index
    %c0_69 = arith.constant 0 : index
    %173 = vector.load %arg9[%c0_67, %c0_68, %c0_69] : memref<1x8x32xf32, #tpu.memory_space<vmem>>, vector<1x8x32xf32>
    tpu.vector_store %arg9[%c0_67, %c0_68, %c0_69], %172 {strides = array<i32>} : memref<1x8x32xf32, #tpu.memory_space<vmem>>, vector<1x8x32xf32>,
    return
  }
  func.func @transform_0(%arg0: i32) -> (i32, i32, i32) {
    %c0_i32 = arith.constant 0 : i32
    %c0_i32_0 = arith.constant 0 : i32
    %c0_i32_1 = arith.constant 0 : i32
    return %arg0, %c0_i32, %c0_i32_0 : i32, i32, i32
  }
  func.func @transform_1(%arg0: i32) -> (i32, i32) {
    %c0_i32 = arith.constant 0 : i32
    %c0_i32_0 = arith.constant 0 : i32
    %c0_i32_1 = arith.constant 0 : i32
    return %c0_i32, %c0_i32_0 : i32, i32
  }
  func.func @transform_2(%arg0: i32) -> (i32, i32) {
    %c0_i32 = arith.constant 0 : i32
    %c0_i32_0 = arith.constant 0 : i32
    %c0_i32_1 = arith.constant 0 : i32
    return %c0_i32, %c0_i32_0 : i32, i32
  }
  func.func @transform_3(%arg0: i32) -> (i32, i32) {
    %c0_i32 = arith.constant 0 : i32
    %c0_i32_0 = arith.constant 0 : i32
    %c0_i32_1 = arith.constant 0 : i32
    return %c0_i32, %c0_i32_0 : i32, i32
  }
  func.func @transform_4(%arg0: i32) -> (i32, i32) {
    %c0_i32 = arith.constant 0 : i32
    %c0_i32_0 = arith.constant 0 : i32
    %c0_i32_1 = arith.constant 0 : i32
    return %c0_i32, %c0_i32_0 : i32, i32
  }
  func.func @transform_5(%arg0: i32) -> (i32, i32) {
    %c0_i32 = arith.constant 0 : i32
    %c0_i32_0 = arith.constant 0 : i32
    %c0_i32_1 = arith.constant 0 : i32
    return %c0_i32, %c0_i32_0 : i32, i32
  }
  func.func @transform_6(%arg0: i32) -> (i32, i32) {
    %c0_i32 = arith.constant 0 : i32
    %c0_i32_0 = arith.constant 0 : i32
    %c0_i32_1 = arith.constant 0 : i32
    return %c0_i32, %c0_i32_0 : i32, i32
  }
  func.func @transform_7(%arg0: i32) -> (i32, i32) {
    %c0_i32 = arith.constant 0 : i32
    %c0_i32_0 = arith.constant 0 : i32
    %c0_i32_1 = arith.constant 0 : i32
    return %c0_i32, %c0_i32_0 : i32, i32
  }
  func.func @transform_8(%arg0: i32) -> (i32, i32, i32) {
    %c0_i32 = arith.constant 0 : i32
    %c0_i32_0 = arith.constant 0 : i32
    %c0_i32_1 = arith.constant 0 : i32
    return %arg0, %c0_i32, %c0_i32_0 : i32, i32, i32
  }
}

</mosaic_0001>

<bundles_post_ra>
// kernel: tpu_custom_call.1
= control target key start
LH: loop header
LB: loop body
LE: loop exit
PB: predicated region body
PF: predicated region fallthrough
CT: control target
= control target key end

     0   :  { %s1854_s0 = inlined_call_operand.hbm [shape: f32[2,8,32], index: 0, kind: input, shape index: {}]   ;;  %s1855_s1 = inlined_call_operand.hbm [shape: f32[4,32], index: 1, kind: input, shape index: {}]   ;;  %s1856_s2 = inlined_call_operand.hbm [shape: bf16[32,96], index: 2, kind: input, shape index: {}]   ;;  %s1857_s3 = inlined_call_operand.vmem [shape: f32[1,96], index: 3, kind: input, shape index: {}]   ;;  %s1858_s4 = inlined_call_operand.hbm [shape: bf16[32,32], index: 4, kind: input, shape index: {}]   ;;  %s1859_s5 = inlined_call_operand.hbm [shape: bf16[32,32], index: 5, kind: input, shape index: {}]   ;;  %s1860_s6 = inlined_call_operand.hbm [shape: bf16[32,32], index: 6, kind: input, shape index: {}]   ;;  %s1861_s7 = inlined_call_operand.vmem [shape: f32[3,32], index: 7, kind: input, shape index: {}]   ;;  %s1862_s8 = inlined_call_operand.hbm [shape: f32[2,8,32], index: 8, kind: output, shape index: {}]  }
   0x1   :  { %1863 = sst [smem:[#allocation20_spill]] %s1855_s1 }
   0x2   :  { %1864 = sst [smem:[#allocation21_spill]] %s1856_s2 }
   0x3   :  { %13 = vsyncpa [#allocation4], 0 }
   0x4   :  { %15 = vsyncpa [#allocation4 + $0x1], 0 }
   0x5   :  { %16 = vsyncpa [#allocation7], 0 }
   0x6   :  { %17 = vsyncpa [#allocation10], 0 }
   0x7   :  { %18 = vsyncpa [#allocation13], 0 }
   0x8   :  { %19 = vsyncpa [#allocation5], 0 }
   0x9   :  { %21 = vsyncpa [#allocation5 + $0x1], 0  ;;  %s1624_s27 = smov 0   ;;  %s1626_s28 = smov 0  }
   0xa   :  { %s1628_s29 = smov 0   ;;  %s1630_s30 = smov 0  }
   0xb LB: > { %s1865_s1 = sld [smem:[#allocation20_spill]]  ;;  %s1648_s12 = sadd.s32 4294967295, %s1555_s30   ;;  %s1555_s30 = sphi %s1630_s30, %s1877_s30   ;;  %s1551_s29 = sphi %s1628_s29, %s1876_s29   ;;  %s1547_s28 = sphi %s1626_s28, %s1875_s28   ;;  %s1543_s27 = sphi %s1624_s27, %s1874_s27  }
   0xc   : > { %p1077_p0 = scmp.ge.s32.totalorder %s1555_s30, 1  ;;  %p48_p1 = scmp.eq.s32.totalorder %s1648_s12, 0 }
   0xd   : > { %p231_p2 = scmp.lt.s32.totalorder %s1555_s30, 3  ;;  %s1557_s14 = smov [#allocation6]  }
   0xe   : > { %s245_s15 = sshll.u32 %s1557_s14, 4  ;;  %s271_s18 = sshll.u32 %s1858_s4, 4  ;;  %s246_s15 = int_to_ptr.vmem [resolvable:$true] %s245_s15  ;;  %s272_s18 = int_to_ptr.hbm [resolvable:$true] %s271_s18 }
   0xf   : > { %p1653_p3 = pnand %p1077_p0, %p231_p2  ;;  %s1868_s2 = sld [smem:[#allocation21_spill]] }
  0x10   : > { %s1558_s23 = smov [#allocation9]   ;;  %s1559_s25 = smov 64  }
  0x11   : > { %s243_s11 = sshll.u32 %s1865_s1, 4  ;;  %p1175_p5 = pneg %p1653_p3  ;;  %s244_s11 = int_to_ptr.hbm [resolvable:$true] %s243_s11 }
  0x12   : > { %s273_s24 = sshll.u32 %s1558_s23, 4  ;;  %s1560_s26 = smov 4   ;;  %s274_s24 = int_to_ptr.vmem [resolvable:$true] %s273_s24 }
  0x13   : > { %p1665_p6 = pnand %p1175_p5, %p48_p1  ;;  %s285_s14 = sshll.u32 %s1859_s5, 4  ;;  %s286_s14 = int_to_ptr.hbm [resolvable:$true] %s285_s14 }
  0x14   : > { %s1561_s16 = smov [#allocation8]   ;;  %s299_s21 = sshll.u32 %s1860_s6, 4  ;;  %s300_s21 = int_to_ptr.hbm [resolvable:$true] %s299_s21 }
  0x15   : > { %s254_s22 = sshll.u32 %s1868_s2, 4  ;;  %s256_s17 = sshll.u32 %s1561_s16, 4  ;;  %s255_s22 = int_to_ptr.hbm [resolvable:$true] %s254_s22  ;;  %s257_s17 = int_to_ptr.vmem [resolvable:$true] %s256_s17 }
  0x16   : > { %1178 = dma.hbm_to_vmem [thread:$0]  (!%p1665_p6), %s244_s11, 64, %s246_s15, [#allocation7]  }
  0x17   : > { %1184 = dma.hbm_to_vmem [thread:$0]  (!%p1665_p6), %s272_s18, 256, %s274_s24, [#allocation10], %s1559_s25, %s1559_s25, %s1560_s26  }
  0x18   : > { %1181 = dma.hbm_to_vmem [thread:$0]  (!%p1665_p6), %s255_s22, 256, %s257_s17, [#allocation7], %s1559_s25, %s1559_s25, %s1560_s26  }
  0x19   : > { %s1562_s11 = smov [#allocation11]   ;;  %s1563_s23 = smov [#allocation12]  }
  0x1a   : > { %s287_s15 = sshll.u32 %s1562_s11, 4  ;;  %s301_s24 = sshll.u32 %s1563_s23, 4  ;;  %s288_s15 = int_to_ptr.vmem [resolvable:$true] %s287_s15  ;;  %s302_s24 = int_to_ptr.vmem [resolvable:$true] %s301_s24 }
  0x1b   : > { %1187 = dma.hbm_to_vmem [thread:$0]  (!%p1665_p6), %s286_s14, 256, %s288_s15, [#allocation10], %s1559_s25, %s1559_s25, %s1560_s26  }
  0x1c   : > { %1190 = dma.hbm_to_vmem [thread:$0]  (!%p1665_p6), %s300_s21, 256, %s302_s24, [#allocation13], %s1559_s25, %s1559_s25, %s1560_s26  }
  0x1d   : > { %s1076_s22 = sadd.s32 4294967294, %s1555_s30   ;;  %s1690_s9 = sadd.s32 1, %s1555_s30  }
  0x1e   : > { %s34_s10 = sadd.s32 1, %s1551_s29  ;;  %s31_s16 = ssub.s32 %s1555_s30, %s1690_s9 }
  0x1f   : > { %p41_p7 = scmp.ne.s32.totalorder %s1551_s29, %s1547_s28  ;;  %p32_p8 = scmp.eq.s32.totalorder %s31_s16, 0 }
  0x20   : > { %p42_p9 = scmp.eq.s32.totalorder %s1555_s30, 0  ;;  %p47_p10 = scmp.ne.s32.totalorder %s1547_s28, %s1543_s27 }
  0x21   : > { %p218_p11 = scmp.eq.s32.totalorder %s1648_s12, 1  ;;  %p224_p0 = scmp.eq.s32.totalorder %s1076_s22, 1 }
  0x22   : > { %s1702_s14 = scalar_select %p32_p8, %s1551_s29, %s34_s10  }
  0x23   : > { %p1706_p12 = por %p48_p1, %p47_p10  ;;  %p1710_p13 = por %p218_p11, %p41_p7 }
  0x24   : > { %p43_p2 = por %p42_p9, %p41_p7  ;;  %s318_s26 = sand.u32 1, %s1551_s29  }
  0x25   : > { %p1715_p5 = por %p224_p0, %p47_p10  ;;  %p1204_p6 = scmp.lt.s32.totalorder %s1555_s30, 2 }
  0x26   : > { %s1084_s11 = sshll.u32 %s318_s26, 3  ;;  %s1085_s15 = sshll.u32 %s1555_s30, 3 }
  0x27   : > { %s326_s21 = scalar_lea.hbm %s1854_s0, %s1085_s15  ;;  %s322_s24 = scalar_lea.vmem [#allocation3], %s1084_s11 }
  0x28   : > { %s328_s23 = sshll.u32 %s326_s21, 4  ;;  %s330_s10 = sshll.u32 %s322_s24, 4  ;;  %s329_s23 = int_to_ptr.hbm [resolvable:$true] %s328_s23  ;;  %s331_s10 = int_to_ptr.vmem [resolvable:$true] %s330_s10 }
  0x29   : > { %p1724_p8 = pnand %p1204_p6, %p43_p2  ;;  %s319_s16 = scalar_lea.sflag [#allocation4], %s318_s26 }
  0x2a   : > { %s1447_s1 = sshra.s32 %s329_s23, 4  ;;  %s1454_s11 = scalar_lea.hbm %s1854_s0, 16  ;;  %s1448_s1 = int_to_ptr.hbm [resolvable:$true] %s1447_s1 }
  0x2b   : > { %s1449_s2 = scalar_lea.hbm %s1448_s1, 8  ;;  %p1451_p9 = pneg %p1724_p8 }
  0x2c   : > { %p1450_p7 = scmp.ne.s32.totalorder %s1448_s1, %s1449_s2  ;;  %p1455_p0 = scmp.lt.s32.totalorder %s1448_s1, %s1854_s0 }
  0x2d   : > { %p1456_p2 = scmp.lt.s32.totalorder %s1454_s11, %s1449_s2 }
  0x2e   : > { %p1452_p10 = pnand %p1451_p9, %p1450_p7 }
  0x2f   : > { %p1457_p6 = por %p1456_p2, %p1455_p0 }
  0x30   : > { %p1453_p11 = pneg %p1452_p10 }
  0x32   : > { %p1458_p4 = pnand %p1457_p6, %p1453_p11 }
  0x34   : > { %1461 = shalt.err (!%p1458_p4)
}
  0x35   : > { %1194 = dma.hbm_to_vmem [thread:$0]  (!%p1724_p8), %s329_s23, 128, %s331_s10, %s319_s16  }
  0x36   : > { %339 = sbr.rel (%p1653_p3) target bundleno = 1765 (0x6e5), region = 52  ;;  %s1741_s26 = sand.u32 (!%p1653_p3), 1, %s1547_s28  }
  0x37   : > { %s1087_s24 = sshll.u32 (!%p1653_p3), %s1741_s26, 3  ;;  %s342_s15 = scalar_lea.sflag (!%p1653_p3), [#allocation4], %s1741_s26 }
  0x38   : > { %s345_s1 = scalar_lea.vmem (!%p1653_p3), [#allocation3], %s1087_s24 }
  0x3b   : > { %1522 = dma.done.wait (%p1706_p12), %s342_s15, 128  }
  0x3c   : > { %1524 = vsyncadd (%p1706_p12), %s342_s15, 4294967168 }
  0x3d   : > { %1526 = dma.done.wait (%p48_p1), [#allocation7], 320  }
  0x3e   : > { %1528 = vsyncadd (%p48_p1), [#allocation7], 4294966976 }
  0x3f   : > { %1530 = dma.done.wait (%p48_p1), [#allocation10], 512  }
  0x40   : > { %1532 = vsyncadd (%p48_p1), [#allocation10], 4294966784 }
  0x41   : > { %1534 = dma.done.wait (%p48_p1), [#allocation13], 256  }
  0x42   : > { %1536 = vsyncadd (%p48_p1), [#allocation13], 4294967040  ;;  %vm413_vm0 = vcmask 261120   ;;  %v1763_v0 = vld [vmem:[%s345_s1] sm:$0xff]  ;;  %v1564_v2 = vmov 32.0   ;;  %v1143_v15 = vld [vmem:[#allocation8] sm:$0xff] }
  0x43   : > { %v414_v1 = vsel %vm413_vm0, %v1763_v0, 0.0  ;;  %1273 = vrcp.f32 %v1564_v2  ;;  %v1144_v14 = vld [vmem:[#allocation8 + $0x8] sm:$0xff]  ;;  %v1265_v25 = vld [vmem:[#allocation6] ss:$0 sm:$0xff]  ;;  %v1266_v28 = vld [vmem:[#allocation6 + $0x1] ss:$0 sm:$0xff] }
  0x44   : > { %415 = vadd.xlane.f32.xlu0 %v414_v1  ;;  %477 = vmatpush.bf16.msra.mxu0 %v1144_v14  ;;  %v1267_v32 = vld [vmem:[%s1857_s3] ss:$0 sm:$0xff]  ;;  %s1565_s19 = smov 104   ;;  %s1566_s23 = smov 120   ;;  %vm490_vm5 = vcmask 64512   ;;  %vm535_vm6 = vcmask 1043456  }
  0x45   : > { %s1567_s10 = smov 96   ;;  %s1568_s22 = smov 72   ;;  %vm553_vm7 = vcmask 60416   ;;  %vm624_vm8 = vcmask 126016   ;;  %vm695_vm9 = vcmask 191616   ;;  %vm766_vm10 = vcmask 257216  }
  0x46   : > { %s1569_s16 = smov 88   ;;  %s1570_s18 = smov 112  }
  0x47   : > { %s1571_s11 = smov 80   ;;  %s1572_s20 = smov 56  }
  0x48   : > { %478 = vmatpush.bf16.msra.mxu0 %v1143_v15  ;;  %s1573_s21 = smov 64   ;;  %s1574_s15 = smov 48  }
  0x49   : > { %v1274_v3 = vpop.eup %1273  ;;  %s1575_s1 = smov 40   ;;  %s1576_s2 = smov 16  }
  0x4a   : > { %v418_v4 = vmul.f32 32.0, %v1274_v3  ;;  %vm422_vm1 = vweird.f32 %v1274_v3  ;;  %s1577_s13 = smov 8  }
  0x4c   : > { %v419_v5 = vsub.f32 1.0, %v418_v4 }
  0x4e   : > { %v420_v6 = vmul.f32 %v1274_v3, %v419_v5 }
  0x50   : > { %v421_v7 = vadd.f32 %v1274_v3, %v420_v6 }
  0x52   : > { %v1767_v8 = vsel %vm422_vm1, %v1274_v3, %v421_v7 }
  0xb7   : > { %v416_v9 = vpop.xlane.xlu0 %415 }
  0xb8   : > { %v424_v10 = vmul.f32 %v1767_v8, %v416_v9 }
  0xba   : > { %v425_v11 = vsub.f32 %v1763_v0, %v424_v10 }
  0xbc   : > { %v426_v12 = vmul.f32 %v425_v11, %v425_v11 }
  0xbe   : > { %v427_v13 = vsel %vm413_vm0, %v426_v12, 0.0 }
  0xbf   : > { %428 = vadd.xlane.f32.xlu0 %v427_v13 }
 0x132   : > { %v429_v16 = vpop.xlane.xlu0 %428 }
 0x133   : > { %v430_v17 = vmul.f32 %v429_v16, %v1767_v8 }
 0x135   : > { %v431_v18 = vadd.f32 1e-05, %v430_v17 }
 0x137   : > { %1275 = vrsqrt.f32 %v431_v18  ;;  %vm438_vm3 = vweird.f32 %v431_v18 }
 0x13d   : > { %v1276_v19 = vpop.eup %1275 }
 0x13e   : > { %v433_v20 = vmul.f32 %v1276_v19, %v431_v18  ;;  %vm439_vm2 = vweird.f32 %v1276_v19 }
 0x13f   : > { %vm440_vm4 = vmor %vm438_vm3, %vm439_vm2 }
 0x140   : > { %v434_v21 = vmul.f32 %v1276_v19, %v433_v20 }
 0x142   : > { %v435_v22 = vmul.f32 0.5, %v434_v21 }
 0x144   : > { %v436_v23 = vsub.f32 1.5, %v435_v22 }
 0x146   : > { %v437_v24 = vmul.f32 %v1276_v19, %v436_v23 }
 0x148   : > { %v441_v26 = vsel %vm440_vm4, %v1276_v19, %v437_v24 }
 0x149   : > { %v442_v27 = vmul.f32 %v441_v26, %v425_v11 }
 0x14b   : > { %v444_v29 = vmul.f32 %v1265_v25, %v442_v27 }
 0x14d   : > { %v446_v30 = vadd.f32 %v1266_v28, %v444_v29 }
 0x14f   : > { %v447_v31 = vpack.c.bf16 %v446_v30, %v446_v30 }
 0x151   : > { %1102 = vmatmul.msk.bf16.vlgmr.msra.gmra.mxu0 %vm413_vm0, %v447_v31 }
 0x1ce   : > { %v480_v33 = vpop.f32.mrf.mxu0 }
 0x1cf   : > { %v481_v34 = vadd.f32 %v1267_v32, %v480_v33 }
 0x1d1   : > { %v484_v35 = vpack.c.bf16 %v481_v34, %v481_v34 }
 0x1d3   : > { %v486_v36 = vunpack.c.l.b16 %v484_v35 }
 0x1d5   : > { %v487_v37 = vpack.c.b16 %v486_v36, %v486_v36 }
 0x1d6   : > { %v482_v38 = vpop.f32.mrf.mxu0 }
 0x1d7   : > { %697 = vrot.lane.b32.xlu0 %v487_v37, %s1565_s19  ;;  %555 = vrot.lane.b32.xlu2 %v487_v37, %s1566_s23  ;;  %s1578_s19 = smov 24  }
 0x1d8   : > { %488 = vrot.lane.b32.xlu1 %v487_v37, %s1567_s10 }
 0x1df   : > { %699 = vrot.lane.b32.xlu2 %v487_v37, %s1568_s22 }
 0x1e0   : > { %557 = vrot.lane.b32.xlu1 %v487_v37, %s1569_s16 }
 0x1e7   : > { %626 = vrot.lane.b32.xlu2 %v487_v37, %s1570_s18  ;;  %s1140_s18 = sshll.u32 %s1648_s12, 3  ;;  %s943_s12 = scalar_lea.sflag [#allocation5], %s1741_s26 }
 0x1e8   : > { %628 = vrot.lane.b32.xlu1 %v487_v37, %s1571_s11 }
 0x1ef   : > { %598 = vrot.lane.b32.xlu2 %v487_v37, %s1572_s20 }
 0x1f0   : > { %530 = vrot.lane.b32.xlu1 %v487_v37, %s1573_s21  ;;  %s953_s21 = scalar_lea.hbm %s1862_s8, %s1140_s18 }
 0x1f7   : > { %669 = vrot.lane.b32.xlu2 %v487_v37, %s1574_s15 }
 0x1f8   : > { %740 = vrot.lane.b32.xlu1 %v487_v37, %s1575_s1 }
 0x231   : > { %v556_v39 = vpop.permute.xlu2 %555 }
 0x239   : > { %v700_v40 = vpop.permute.xlu2 %699 }
 0x23a   : > { %v705_v49 = vsel %vm490_vm5, %v700_v40, 0 }
 0x241   : > { %v627_v41 = vpop.permute.xlu2 %626 }
 0x249   : > { %v599_v42 = vpop.permute.xlu2 %598  ;;  %v698_v55 = vpop.permute.xlu0 %697 }
 0x24a   : > { %v489_v43 = vpop.permute.xlu1 %488  ;;  %v604_v54 = vsel %vm535_vm6, %v599_v42, 0 }
 0x24b   : > { %v495_v44 = vsel %vm490_vm5, %v489_v43, 0 }
 0x24c   : > { %504 = vmatpush.bf16.xpose.msra.mxu1 %v495_v44 }
 0x251   : > { %v670_v45 = vpop.permute.xlu2 %669 }
 0x252   : > { %v558_v46 = vpop.permute.xlu1 %557  ;;  %v675_v47 = vsel %vm535_vm6, %v670_v45, 0 }
 0x253   : > { %1103 = vmatmul.msk.bf16.vlgmr.msra.gmra.mxu1 %vm490_vm5, %v484_v35  ;;  %v563_v48 = vsel %vm490_vm5, %v558_v46, 0 }
 0x254   : > { %572 = vmatpush.bf16.xpose.msra.mxu3 %v563_v48  ;;  %684 = vmatpush.bf16.msrb.mxu1 %v675_v47 }
 0x25a   : > { %v629_v50 = vpop.permute.xlu1 %628 }
 0x25b   : > { %1105 = vmatmul.msk.bf16.vlgmr.msra.gmra.mxu3 %vm490_vm5, %v556_v39  ;;  %v634_v51 = vsel %vm490_vm5, %v629_v50, 0 }
 0x25c   : > { %714 = vmatpush.bf16.xpose.msrb.mxu3 %v705_v49  ;;  %643 = vmatpush.bf16.xpose.msrb.mxu0 %v634_v51 }
 0x262   : > { %v531_v52 = vpop.permute.xlu1 %530 }
 0x263   : > { %1107 = vmatmul.msk.bf16.vlgmr.msrb.gmra.mxu0 %vm490_vm5, %v627_v41  ;;  %v537_v53 = vsel %vm535_vm6, %v531_v52, 0 }
 0x264   : > { %546 = vmatpush.bf16.msra.mxu2 %v537_v53 }
 0x268   : > { %613 = vmatpush.bf16.msrb.mxu2 %v604_v54 }
 0x26b   : > { %1109 = vmatmul.msk.bf16.vlgmr.msrb.gmra.mxu3 %vm490_vm5, %v698_v55 }
 0x2d0   : > { %v506_v56 = vpop.f32.mrf.mxu1 }
 0x2d1   : > { %v510_v57 = vsel %vm490_vm5, %v506_v56, -inf }
 0x2d2   : > { %v511_v58 = vrot.slane %v510_v57, 4 }
 0x2d4   : > { %v512_v59 = vmax.f32 %v510_v57, %v511_v58 }
 0x2d6   : > { %v513_v60 = vrot.slane %v512_v59, 2 }
 0x2d8   : > { %v514_v61 = vmax.f32 %v512_v59, %v513_v60  ;;  %v508_v62 = vpop.f32.mrf.mxu1 }
 0x2da   : > { %v515_v63 = vrot.slane %v514_v61, 1 }
 0x2dc   : > { %v516_v1 = vmax.f32 %v514_v61, %v515_v63 }
 0x2de   : > { %v517_v2 = vsub.f32 %v506_v56, %v516_v1  ;;  %v574_v3 = vpop.f32.mrf.mxu3  ;;  %v741_v56 = vpop.permute.xlu1 %740 }
 0x2df   : > { %v578_v4 = vsel %vm490_vm5, %v574_v3, -inf  ;;  %v746_v63 = vsel %vm535_vm6, %v741_v56, 0 }
 0x2e0   : > { %v518_v5 = vmul.f32 1.442695, %v517_v2  ;;  %v579_v6 = vrot.slane %v578_v4, 4  ;;  %v645_v7 = vpop.f32.mrf.mxu0 }
 0x2e1   : > { %v649_v9 = vsel %vm490_vm5, %v645_v7, -inf }
 0x2e2   : > { %1277 = vpow2.f32 %v518_v5  ;;  %v580_v10 = vmax.f32 %v578_v4, %v579_v6  ;;  %v650_v11 = vrot.slane %v649_v9, 4 }
 0x2e4   : > { %v581_v12 = vrot.slane %v580_v10, 2  ;;  %v651_v13 = vmax.f32 %v649_v9, %v650_v11 }
 0x2e6   : > { %v582_v14 = vmax.f32 %v580_v10, %v581_v12  ;;  %v652_v15 = vrot.slane %v651_v13, 2  ;;  %v576_v16 = vpop.f32.mrf.mxu3 }
 0x2e8   : > { %v1278_v17 = vpop.eup %1277  ;;  %v583_v18 = vrot.slane %v582_v14, 1  ;;  %v653_v19 = vmax.f32 %v651_v13, %v652_v15  ;;  %v647_v20 = vpop.f32.mrf.mxu0 }
 0x2e9   : > { %v520_v21 = vsel %vm490_vm5, %v1278_v17, 0.0 }
 0x2ea   : > { %v521_v22 = vrot.slane %v520_v21, 4  ;;  %v584_v23 = vmax.f32 %v582_v14, %v583_v18  ;;  %v654_v24 = vrot.slane %v653_v19, 1 }
 0x2ec   : > { %v522_v25 = vadd.f32 %v521_v22, %v520_v21  ;;  %v585_v26 = vsub.f32 %v574_v3, %v584_v23  ;;  %v655_v27 = vmax.f32 %v653_v19, %v654_v24 }
 0x2ee   : > { %v523_v28 = vrot.slane %v522_v25, 2  ;;  %v586_v29 = vmul.f32 1.442695, %v585_v26  ;;  %v656_v30 = vsub.f32 %v645_v7, %v655_v27  ;;  %v716_v31 = vpop.f32.mrf.mxu3 }
 0x2ef   : > { %v720_v32 = vsel %vm490_vm5, %v716_v31, -inf }
 0x2f0   : > { %v524_v33 = vadd.f32 %v523_v28, %v522_v25  ;;  %1279 = vpow2.f32 %v586_v29  ;;  %v657_v34 = vmul.f32 1.442695, %v656_v30  ;;  %v721_v35 = vrot.slane %v720_v32, 4 }
 0x2f2   : > { %1281 = vpow2.f32 %v657_v34  ;;  %v722_v36 = vmax.f32 %v720_v32, %v721_v35  ;;  %v525_v37 = vrot.slane %v524_v33, 1  ;;  %v1146_v34 = vld [vmem:[#allocation9 + $0x8] sm:$0xff]  ;;  %v1145_v35 = vld [vmem:[#allocation9] sm:$0xff] }
 0x2f3   : > { %795 = vmatpush.bf16.msra.mxu0 %v1146_v34 }
 0x2f4   : > { %v723_v38 = vrot.slane %v722_v36, 2  ;;  %v526_v39 = vadd.f32 %v525_v37, %v524_v33 }
 0x2f6   : > { %v1280_v40 = vpop.eup %1279  ;;  %v724_v41 = vmax.f32 %v722_v36, %v723_v38  ;;  %v718_v42 = vpop.f32.mrf.mxu3  ;;  %1283 = vrcp.f32 %v526_v39 }
 0x2f7   : > { %v588_v43 = vsel %vm490_vm5, %v1280_v40, 0.0  ;;  %796 = vmatpush.bf16.msra.mxu0 %v1145_v35 }
 0x2f8   : > { %v1282_v44 = vpop.eup %1281  ;;  %v589_v45 = vrot.slane %v588_v43, 4  ;;  %v725_v46 = vrot.slane %v724_v41, 1 }
 0x2f9   : > { %v659_v47 = vsel %vm490_vm5, %v1282_v44, 0.0 }
 0x2fa   : > { %v590_v48 = vadd.f32 %v589_v45, %v588_v43  ;;  %v660_v49 = vrot.slane %v659_v47, 4  ;;  %v726_v50 = vmax.f32 %v724_v41, %v725_v46 }
 0x2fc   : > { %v1284_v51 = vpop.eup %1283  ;;  %v591_v52 = vrot.slane %v590_v48, 2  ;;  %v661_v53 = vadd.f32 %v660_v49, %v659_v47  ;;  %v727_v54 = vsub.f32 %v716_v31, %v726_v50 }
 0x2fd   : > { %v528_v55 = vmul.f32 %v1284_v51, %v1278_v17  ;;  %v1148_v51 = vld [vmem:[#allocation11 + $0x8] sm:$0xff] }
 0x2fe   : > { %v592_v57 = vadd.f32 %v591_v52, %v590_v48  ;;  %v662_v58 = vrot.slane %v661_v53, 2  ;;  %v728_v59 = vmul.f32 1.442695, %v727_v54  ;;  %856 = vmatpush.bf16.msra.mxu1 %v1148_v51  ;;  %v1147_v52 = vld [vmem:[#allocation11] sm:$0xff]  ;;  %v1272_v51 = vld [vmem:[%s1861_s7 + $0x2] ss:$0 sm:$0xff] }
 0x2ff   : > { %v529_v60 = vpack.c.bf16 %v528_v55, %v528_v55 }
 0x300   : > { %v593_v61 = vrot.slane %v592_v57, 1  ;;  %v663_v62 = vadd.f32 %v662_v58, %v661_v53  ;;  %1285 = vpow2.f32 %v728_v59 }
 0x301   : > { %1104 = vmatmul.msk.bf16.vlgmr.msra.gmra.mxu2 %vm490_vm5, %v529_v60 }
 0x302   : > { %v594_v1 = vadd.f32 %v593_v61, %v592_v57  ;;  %v664_v2 = vrot.slane %v663_v62, 1  ;;  %755 = vmatpush.bf16.msra.mxu2 %v746_v63  ;;  %857 = vmatpush.bf16.msra.mxu1 %v1147_v52  ;;  %v1269_v61 = vld [vmem:[#allocation6 + $0x2] ss:$0 sm:$0xff] }
 0x304   : > { %v665_v3 = vadd.f32 %v664_v2, %v663_v62  ;;  %1287 = vrcp.f32 %v594_v1  ;;  %v1270_v1 = vld [vmem:[#allocation6 + $0x3] ss:$0 sm:$0xff] }
 0x306   : > { %v1286_v4 = vpop.eup %1285  ;;  %1289 = vrcp.f32 %v665_v3 }
 0x307   : > { %v730_v5 = vsel %vm490_vm5, %v1286_v4, 0.0 }
 0x308   : > { %v731_v6 = vrot.slane %v730_v5, 4 }
 0x30a   : > { %v1288_v7 = vpop.eup %1287  ;;  %v732_v9 = vadd.f32 %v731_v6, %v730_v5 }
 0x30b   : > { %v596_v10 = vmul.f32 %v1288_v7, %v1280_v40  ;;  %v1268_v40 = vld [vmem:[%s1861_s7] ss:$0 sm:$0xff] }
 0x30c   : > { %v1290_v11 = vpop.eup %1289  ;;  %v733_v12 = vrot.slane %v732_v9, 2 }
 0x30d   : > { %v667_v13 = vmul.f32 %v1290_v11, %v1282_v44  ;;  %v597_v15 = vpack.c.bf16 %v596_v10, %v596_v10 }
 0x30e   : > { %v734_v14 = vadd.f32 %v733_v12, %v732_v9 }
 0x30f   : > { %v668_v16 = vpack.c.bf16 %v667_v13, %v667_v13 }
 0x310   : > { %v735_v17 = vrot.slane %v734_v14, 1 }
 0x311   : > { %1106 = vmatmul.msk.bf16.vlgmr.msrb.gmra.mxu2 %vm490_vm5, %v597_v15  ;;  %1108 = vmatmul.msk.bf16.vlgmr.msrb.gmra.mxu1 %vm490_vm5, %v668_v16 }
 0x312   : > { %v736_v18 = vadd.f32 %v735_v17, %v734_v14 }
 0x314   : > { %1291 = vrcp.f32 %v736_v18 }
 0x31a   : > { %v1292_v19 = vpop.eup %1291 }
 0x31b   : > { %v738_v20 = vmul.f32 %v1292_v19, %v1286_v4 }
 0x31d   : > { %v739_v21 = vpack.c.bf16 %v738_v20, %v738_v20  ;;  %v1150_v20 = vld [vmem:[#allocation12 + $0x8] sm:$0xff] }
 0x31e   : > { %934 = vmatpush.bf16.msra.mxu3 %v1150_v20 }
 0x321   : > { %1110 = vmatmul.msk.bf16.vlgmr.msra.gmra.mxu2 %vm490_vm5, %v739_v21 }
 0x384   : > { %v548_v22 = vpop.f32.mrf.mxu2 }
 0x385   : > { %v552_v23 = vpack.c.bf16 %v548_v22, %v548_v22 }
 0x387   : > { %554 = vst.msk [vmem:[#allocation2] sm:$0xf] %vm553_vm7, %v552_v23 }
 0x38c   : > { %v550_v24 = vpop.f32.mrf.mxu2 }
 0x38d   : > { %v1149_v24 = vld [vmem:[#allocation12] sm:$0xff] }
 0x38e   : > { %v686_v25 = vpop.f32.mrf.mxu1  ;;  %935 = vmatpush.bf16.msra.mxu3 %v1149_v24 }
 0x38f   : > { %v690_v26 = vpack.c.bf16 %v686_v25, %v686_v25 }
 0x391   : > { %692 = vrot.lane.b32.xlu1 %v690_v26, %s1576_s2  ;;  %s403_s2 = scalar_lea.vmem [#allocation14], %s1087_s24  ;;  %s1497_s24 = scalar_lea.hbm %s1862_s8, 16 }
 0x394   : > { %v615_v27 = vpop.f32.mrf.mxu2 }
 0x395   : > { %v619_v28 = vpack.c.bf16 %v615_v27, %v615_v27 }
 0x396   : > { %v688_v29 = vpop.f32.mrf.mxu1 }
 0x397   : > { %621 = vrot.lane.b32.xlu0 %v619_v28, %s1577_s13  ;;  %s955_s13 = sshll.u32 %s403_s2, 4  ;;  %s956_s13 = int_to_ptr.vmem [resolvable:$true] %s955_s13 }
 0x39c   : > { %v617_v30 = vpop.f32.mrf.mxu2 }
 0x3a4   : > { %v757_v31 = vpop.f32.mrf.mxu2 }
 0x3a5   : > { %v761_v32 = vpack.c.bf16 %v757_v31, %v757_v31 }
 0x3a7   : > { %763 = vrot.lane.b32.xlu2 %v761_v32, %s1578_s19  ;;  %s957_s19 = sshll.u32 %s953_s21, 4  ;;  %s958_s19 = int_to_ptr.hbm [resolvable:$true] %s957_s19 }
 0x3a8   : > { %s1491_s23 = sshra.s32 %s958_s19, 4  ;;  %s1492_s23 = int_to_ptr.hbm [resolvable:$true] %s1491_s23 }
 0x3a9   : > { %s1493_s10 = scalar_lea.hbm %s1492_s23, 8  ;;  %p1498_p12 = scmp.lt.s32.totalorder %s1492_s23, %s1862_s8 }
 0x3aa   : > { %p1494_p1 = scmp.ne.s32.totalorder %s1492_s23, %s1493_s10  ;;  %p1499_p8 = scmp.lt.s32.totalorder %s1497_s24, %s1493_s10 }
 0x3ac   : > { %v759_v33 = vpop.f32.mrf.mxu2  ;;  %p1495_p3 = pnand %p1494_p1, %p1710_p13  ;;  %p1500_p7 = por %p1499_p8, %p1498_p12 }
 0x3ae   : > { %p1496_p4 = pneg %p1495_p3 }
 0x3b0   : > { %p1501_p9 = pnand %p1500_p7, %p1496_p4 }
 0x401   : > { %v764_v38 = vpop.permute.xlu2 %763 }
 0x403   : > { %v693_v37 = vpop.permute.xlu1 %692 }
 0x409   : > { %v622_v36 = vpop.permute.xlu0 %621 }
 0x40a   : > { %625 = vst.msk [vmem:[#allocation2] sm:$0xf] %vm624_vm8, %v622_v36 }
 0x40b   : > { %696 = vst.msk [vmem:[#allocation2] sm:$0xf] %vm695_vm9, %v693_v37 }
 0x40c   : > { %767 = vst.msk [vmem:[#allocation2] sm:$0xf] %vm766_vm10, %v764_v38 }
 0x413   : > { %v768_v39 = vld [vmem:[#allocation2] sm:$0xf] }
 0x414   : > { %1119 = vmatmul.msk.bf16.vlgmr.msra.gmra.mxu0 %vm413_vm0, %v768_v39 }
 0x491   : > { %v798_v41 = vpop.f32.mrf.mxu0 }
 0x492   : > { %v799_v42 = vadd.f32 %v1268_v40, %v798_v41 }
 0x494   : > { %v802_v43 = vadd.f32 %v799_v42, %v1763_v0 }
 0x496   : > { %v803_v44 = vsel %vm413_vm0, %v802_v43, 0.0 }
 0x497   : > { %804 = vadd.xlane.f32.xlu0 %v803_v44 }
 0x499   : > { %v800_v45 = vpop.f32.mrf.mxu0 }
 0x50a   : > { %v805_v46 = vpop.xlane.xlu0 %804 }
 0x50b   : > { %v806_v47 = vmul.f32 %v805_v46, %v1767_v8 }
 0x50d   : > { %v807_v48 = vsub.f32 %v802_v43, %v806_v47 }
 0x50f   : > { %v808_v49 = vmul.f32 %v807_v48, %v807_v48 }
 0x511   : > { %v809_v50 = vsel %vm413_vm0, %v808_v49, 0.0 }
 0x512   : > { %810 = vadd.xlane.f32.xlu1 %v809_v50 }
 0x585   : > { %v811_v53 = vpop.xlane.xlu1 %810 }
 0x586   : > { %v812_v54 = vmul.f32 %v811_v53, %v1767_v8  ;;  %v1271_v8 = vld [vmem:[%s1861_s7 + $0x1] ss:$0 sm:$0xff] }
 0x588   : > { %v813_v0 = vadd.f32 1e-05, %v812_v54 }
 0x58a   : > { %1293 = vrsqrt.f32 %v813_v0  ;;  %vm820_vm12 = vweird.f32 %v813_v0 }
 0x590   : > { %v1294_v55 = vpop.eup %1293 }
 0x591   : > { %v815_v56 = vmul.f32 %v1294_v55, %v813_v0  ;;  %vm821_vm11 = vweird.f32 %v1294_v55 }
 0x592   : > { %vm822_vm13 = vmor %vm820_vm12, %vm821_vm11 }
 0x593   : > { %v816_v57 = vmul.f32 %v1294_v55, %v815_v56 }
 0x595   : > { %v817_v58 = vmul.f32 0.5, %v816_v57 }
 0x597   : > { %v818_v59 = vsub.f32 1.5, %v817_v58 }
 0x599   : > { %v819_v60 = vmul.f32 %v1294_v55, %v818_v59 }
 0x59b   : > { %v823_v62 = vsel %vm822_vm13, %v1294_v55, %v819_v60 }
 0x59c   : > { %v824_v63 = vmul.f32 %v823_v62, %v807_v48 }
 0x59e   : > { %v826_v2 = vmul.f32 %v1269_v61, %v824_v63 }
 0x5a0   : > { %v828_v3 = vadd.f32 %v1270_v1, %v826_v2 }
 0x5a2   : > { %v829_v4 = vpack.c.bf16 %v828_v3, %v828_v3 }
 0x5a4   : > { %1128 = vmatmul.msk.bf16.vlgmr.msra.gmra.mxu1 %vm413_vm0, %v829_v4 }
 0x621   : > { %v859_v5 = vpop.f32.mrf.mxu1 }
 0x622   : > { %v860_v6 = vadd.f32 %v1271_v8, %v859_v5 }
 0x624   : > { %v864_v7 = vmul.f32 0.70710677, %v860_v6  ;;  %v863_v47 = vmul.f32 0.5, %v860_v6 }
 0x626   : > { %v865_v9 = vmul.f32 %v864_v7, %v864_v7 }
 0x628   : > { %v866_v10 = vmin.f32 %v865_v9, 16.0 }
 0x629   : > { %v861_v11 = vpop.f32.mrf.mxu1 }
 0x62a   : > { %v867_v12 = vmul.f32 2.1237322e-06, %v866_v10  ;;  %v878_v13 = vmul.f32 3.8918573e-05, %v866_v10 }
 0x62c   : > { %v868_v14 = vadd.f32 0.00028619796, %v867_v12  ;;  %v879_v15 = vadd.f32 0.001143296, %v878_v13 }
 0x62e   : > { %v869_v16 = vmul.f32 %v868_v14, %v866_v10  ;;  %v880_v17 = vmul.f32 %v879_v15, %v866_v10 }
 0x630   : > { %v881_v18 = vadd.f32 0.014752088, %v880_v17  ;;  %v870_v19 = vadd.f32 0.0036580483, %v869_v16 }
 0x632   : > { %v882_v21 = vmul.f32 %v881_v18, %v866_v10  ;;  %v871_v23 = vmul.f32 %v870_v19, %v866_v10 }
 0x634   : > { %v883_v22 = vadd.f32 0.112945676, %v882_v21  ;;  %v872_v27 = vadd.f32 0.05243302, %v871_v23 }
 0x636   : > { %v884_v25 = vmul.f32 %v883_v22, %v866_v10  ;;  %v873_v30 = vmul.f32 %v872_v27, %v866_v10 }
 0x638   : > { %v885_v26 = vadd.f32 0.4994258, %v884_v25  ;;  %v874_v31 = vadd.f32 0.18741608, %v873_v30 }
 0x63a   : > { %v886_v28 = vmul.f32 %v885_v26, %v866_v10  ;;  %v875_v33 = vmul.f32 %v874_v31, %v866_v10 }
 0x63c   : > { %v887_v29 = vadd.f32 1.0, %v886_v28  ;;  %v876_v37 = vadd.f32 1.1283791, %v875_v33 }
 0x63e   : > { %1295 = vrcp.f32 %v887_v29  ;;  %v899_v36 = vand.u32 2147483648, %v887_v29  ;;  %v897_v39 = vand.u32 2147483647, %v887_v29  ;;  %vm893_vm15 = vweird.f32 %v887_v29 }
 0x63f   : > { %v877_v42 = vmul.f32 %v876_v37, %v864_v7 }
 0x640   : > { %v900_v41 = vor.u32 1.1754944e-38, %v899_v36  ;;  %vm898_vm2 = vcmp.eq.f32.partialorder %v897_v39, 8.507059e+37 }
 0x644   : > { %v1296_v32 = vpop.eup %1295 }
 0x645   : > { %v889_v34 = vmul.f32 %v1296_v32, %v887_v29  ;;  %vm894_vm14 = vweird.f32 %v1296_v32 }
 0x646   : > { %vm895_vm1 = vmor %vm893_vm15, %vm894_vm14 }
 0x647   : > { %v890_v35 = vsub.f32 1.0, %v889_v34 }
 0x649   : > { %v891_v38 = vmul.f32 %v1296_v32, %v890_v35 }
 0x64b   : > { %v892_v40 = vadd.f32 %v1296_v32, %v891_v38 }
 0x64d   : > { %v896_v43 = vsel %vm895_vm1, %v1296_v32, %v892_v40 }
 0x64e   : > { %v901_v44 = vsel %vm898_vm2, %v900_v41, %v896_v43 }
 0x64f   : > { %v902_v45 = vmul.f32 %v901_v44, %v877_v42 }
 0x651   : > { %v1129_v46 = vclamps-f32 %v902_v45, 1.0 }
 0x653   : > { %v905_v48 = vadd.f32 1.0, %v1129_v46 }
 0x655   : > { %v906_v49 = vmul.f32 %v905_v48, %v863_v47 }
 0x657   : > { %v907_v50 = vpack.c.bf16 %v906_v49, %v906_v49 }
 0x659   : > { %1138 = vmatmul.msk.bf16.vlgmr.msra.gmra.mxu3 %vm413_vm0, %v907_v50 }
 0x6dc   : > { %v937_v52 = vpop.f32.mrf.mxu3 }
 0x6dd   : > { %v938_v53 = vadd.f32 %v1272_v51, %v937_v52 }
 0x6df   : > { %941 = vst.msk [vmem:[%s403_s2] sm:$0xff] %vm413_vm0, %v938_v53 }
 0x6e0   : > { %1504 = shalt.err (!%p1501_p9)
}
 0x6e1   : > { %1173 = dma.vmem_to_hbm [thread:$0]  (%p1710_p13), %s956_s13, 128, %s958_s19, %s943_s12  }
 0x6e4   : > { %v939_v54 = vpop.f32.mrf.mxu3 }
 0x6e5 PF: > { %s969_s26 = sand.u32 1, %s1543_s27   ;;  %p1873_p10 = scmp.ge.s32.totalorder %s1555_s30, 2 }
 0x6e6   : > { %s970_s20 = scalar_lea.sflag [#allocation5], %s969_s26 }
 0x6e7   : > { %p1196_p11 = pnand %p1873_p10, %p1715_p5 }
 0x6e9   : > { %p1197_p0 = pneg %p1196_p11 }
 0x6eb   : > { %1538 = dma.done.wait (%p1197_p0), %s970_s20, 128  }
 0x6ec   : > { %1540 = vsyncadd (%p1197_p0), %s970_s20, 4294967168  ;;  %p24_p2 = scmp.ge.s32.totalorder %s1690_s9, 4   ;;  %s1874_s27 = smov %s1547_s28 }
 0x6ed   : > { %s1875_s28 = smov %s1551_s29  ;;  %s1876_s29 = smov %s1702_s14 }
 0x6ee   : > { %s1877_s30 = smov %s1690_s9  ;;  %26 = sbr.rel (!%p24_p2) target bundleno = 11 (0xb), region = 117 }
 0x6f3   :  { %976 = vsyncpa [#allocation4], 1 }
 0x6f4   :  { %978 = vsyncpa [#allocation4 + $0x1], 1 }
 0x6f5   :  { %979 = vsyncpa [#allocation7], 1 }
 0x6f6   :  { %980 = vsyncpa [#allocation10], 1 }
 0x6f7   :  { %981 = vsyncpa [#allocation13], 1 }
 0x6f8   :  { %982 = vsyncpa [#allocation5], 1 }
 0x6f9   :  { %984 = vsyncpa [#allocation5 + $0x1], 1 }

</bundles_post_ra>
